<compile_context>
chip_gen: v7x
topology: tpu7x:2x2x1
jax: 0.10.0
libtpu: 0.0.40
codegen_flags: <defaults>
</compile_context>

<pallas_src>
import functools

import jax
import jax.numpy as jnp
from jax.experimental import pallas as pl
from jax.experimental.pallas import tpu as pltpu


def _conv3x3_s2_kernel(t00, t01, t02, t10, t11, t12, w_ref, bias_ref, o_ref,
                       *, Ho, Wo, apply_relu_input):
    """One batch element: out = sum_{kh,kw} tap(kh,kw) @ W[kh,kw] + bias.

    taps[p*3 + kw] is a (Hq*Wo, Cin) bf16 ref with
        taps[p*3+kw][hq*Wo + wo, :] = x_pad[2*hq + p, 2*wo + kw, :]
    so tap (kh, kw) is rows [(kh//2)*Wo, (kh//2)*Wo + Ho*Wo) of taps[(kh%2)*3+kw].
    """
    taps = (t00, t01, t02, t10, t11, t12)
    M = Ho * Wo
    cout = o_ref.shape[-1]

    acc = jnp.zeros((M, cout), jnp.float32)
    for kh in range(3):
        p, dh = kh % 2, kh // 2
        for kw in range(3):
            lhs = taps[p * 3 + kw][pl.ds(dh * Wo, M), :]      # (M, Cin) bf16
            if apply_relu_input:                              # F.relu(p6) fused here (VPU)
                lhs = jnp.maximum(lhs, 0.0)
            acc = acc + jnp.dot(lhs, w_ref[kh * 3 + kw],      # (Cin, Cout) bf16
                                preferred_element_type=jnp.float32)
    o_ref[...] = (acc + bias_ref[...]).astype(o_ref.dtype)


def _make_tap_phases(x_nhwc, Ho, Wo):
    """Build the six (N, (Ho+1)*Wo, Cin) bf16 tap-phase operands (see kernel doc)."""
    N, H, W, C = x_nhwc.shape
    Hq = Ho + 1
    Hp, Wp = 2 * Ho + 2, 2 * Wo + 2       # padded sizes (1 top/left + enough bottom/right)
    xp = jnp.pad(x_nhwc.astype(jnp.bfloat16),
                 ((0, 0), (1, Hp - 1 - H), (1, Wp - 1 - W), (0, 0)))
    taps = []
    for p in range(2):                                      # row parity (kh % 2)
        rows = xp[:, p::2, :, :][:, :Hq, :, :]              # (N, Hq, Wp, C)
        for kw in range(3):                                 # column tap
            t = rows[:, :, kw::2, :][:, :, :Wo, :]          # (N, Hq, Wo, C)
            taps.append(t.reshape(N, Hq * Wo, C))
    return taps


def conv3x3_s2_pallas(x_nhwc, w_hwio, bias, *, apply_relu_input=False):
    """3x3 conv, stride 2, padding 1.  w_hwio: (3,3,Cin,Cout), bias: (Cout,)."""
    N, H, W, Cin = x_nhwc.shape
    Cout = w_hwio.shape[3]
    Ho, Wo = (H + 1) // 2, (W + 1) // 2
    Hq = Ho + 1
    M = Ho * Wo

    taps = _make_tap_phases(x_nhwc, Ho, Wo)                 # 6 x (N, Hq*Wo, Cin) bf16
    w_taps = w_hwio.reshape(9, Cin, Cout).astype(jnp.bfloat16)   # (kh*3+kw, Cin, Cout)
    bias_row = bias.reshape(1, Cout).astype(jnp.float32)

    kernel = functools.partial(_conv3x3_s2_kernel, Ho=Ho, Wo=Wo,
                               apply_relu_input=apply_relu_input)

    flops = 2 * N * M * 9 * Cin * Cout
    bytes_accessed = (6 * N * Hq * Wo * Cin * 2             # bf16 tap operands
                      + 9 * Cin * Cout * 2                  # bf16 weights (resident)
                      + N * M * Cout * 4)                   # f32 output

    tap_spec = pl.BlockSpec((None, Hq * Wo, Cin), lambda n: (n, 0, 0))

    out = pl.pallas_call(
        kernel,
        out_shape=jax.ShapeDtypeStruct((N, M, Cout), jnp.float32),
        grid_spec=pltpu.PrefetchScalarGridSpec(
            num_scalar_prefetch=0,
            grid=(N,),
            in_specs=[tap_spec] * 6 + [
                # constant index_map -> weight/bias stay resident, no re-DMA per step
                pl.BlockSpec((9, Cin, Cout), lambda n: (0, 0, 0)),
                pl.BlockSpec((1, Cout), lambda n: (0, 0)),
            ],
            out_specs=pl.BlockSpec((None, M, Cout), lambda n: (n, 0, 0)),
        ),
        compiler_params=pltpu.CompilerParams(
            dimension_semantics=("parallel",),               # 2 steps -> both v7x TCs
            vmem_limit_bytes=64 * 1024 * 1024,               # v5e default (16 MiB) is too small for Cin=2048
        ),
        cost_estimate=pl.CostEstimate(flops=flops, transcendentals=0,
                                      bytes_accessed=bytes_accessed),
    )(*taps, w_taps, bias_row)

    return out.reshape(N, Ho, Wo, Cout)


class LastLevelP6P7:
    """JAX/Pallas port of fcos_core LastLevelP6P7."""

    def __init__(self, in_channels, out_channels, key):
        k6, k7 = jax.random.split(key)

        def kaiming_uniform(k, cin, cout):
            # nn.init.kaiming_uniform_(w, a=1): gain = sqrt(2/(1+1^2)) = 1,
            # fan_in = cin*3*3, bound = gain*sqrt(3/fan_in)
            fan_in = cin * 9
            bound = (3.0 / fan_in) ** 0.5
            return jax.random.uniform(k, (3, 3, cin, cout), jnp.float32, -bound, bound)

        self.w6 = kaiming_uniform(k6, in_channels, out_channels)
        self.b6 = jnp.zeros((out_channels,), jnp.float32)
        self.w7 = kaiming_uniform(k7, out_channels, out_channels)
        self.b7 = jnp.zeros((out_channels,), jnp.float32)
        self.use_P5 = in_channels == out_channels

    def __call__(self, c5_nchw, p5_nchw):
        x_nchw = p5_nchw if self.use_P5 else c5_nchw
        x = jnp.transpose(x_nchw, (0, 2, 3, 1))              # NCHW -> NHWC, boundary only
        p6 = conv3x3_s2_pallas(x, self.w6, self.b6, apply_relu_input=False)
        p7 = conv3x3_s2_pallas(p6, self.w7, self.b7, apply_relu_input=True)
        return [jnp.transpose(p6, (0, 3, 1, 2)),             # back to NCHW at the boundary
                jnp.transpose(p7, (0, 3, 1, 2))]


def _ref_conv(x_nchw, w_hwio, bias, relu_input=False):
    """XLA reference conv with the same bf16-operand / f32-accumulate precision."""
    x = jnp.maximum(x_nchw, 0.0) if relu_input else x_nchw
    w_oihw = jnp.transpose(w_hwio, (3, 2, 0, 1))
    out = jax.lax.conv_general_dilated(
        x.astype(jnp.bfloat16), w_oihw.astype(jnp.bfloat16),
        window_strides=(2, 2), padding=((1, 1), (1, 1)),
        dimension_numbers=("NCHW", "OIHW", "NCHW"),
        preferred_element_type=jnp.float32)
    return out + bias[None, :, None, None]


if __name__ == "__main__":
    key = jax.random.PRNGKey(0)
    k_c5, k_p5, k_params = jax.random.split(key, 3)

    in_channels, out_channels = 16, 32     # in != out -> use_P5 False -> conv runs on c5
    N, H, W = 2, 16, 16
    c5 = jax.random.normal(k_c5, (N, in_channels, H, W), jnp.float32)
    p5 = jax.random.normal(k_p5, (N, out_channels, H, W), jnp.float32)

    module = LastLevelP6P7(in_channels, out_channels, k_params)
    p6, p7 = module(c5, p5)
    jax.block_until_ready(p6)
    jax.block_until_ready(p7)

    assert p6.shape == (N, out_channels, H // 2, W // 2)
    assert p7.shape == (N, out_channels, H // 4, W // 4)

    # Cross-check against XLA's conv (same bf16/f32 precision as the kernel).
    p6_ref = _ref_conv(c5, module.w6, module.b6, relu_input=False)
    p7_ref = _ref_conv(p6_ref, module.w7, module.b7, relu_input=True)
    assert jnp.allclose(p6, p6_ref, atol=3e-2, rtol=3e-2)
    assert jnp.allclose(p7, p7_ref, atol=3e-2, rtol=3e-2)

    print("KERNEL_OK")
</pallas_src>

<mosaic_0001>
module attributes {stable_mosaic.version = 11 : i64} {
  func.func @_conv3x3_s2_kernel(%arg0: i32, %arg1: memref<1x72x16xbf16, #tpu.memory_space<vmem>>, %arg2: memref<1x72x16xbf16, #tpu.memory_space<vmem>>, %arg3: memref<1x72x16xbf16, #tpu.memory_space<vmem>>, %arg4: memref<1x72x16xbf16, #tpu.memory_space<vmem>>, %arg5: memref<1x72x16xbf16, #tpu.memory_space<vmem>>, %arg6: memref<1x72x16xbf16, #tpu.memory_space<vmem>>, %arg7: memref<9x16x32xbf16, #tpu.memory_space<vmem>>, %arg8: memref<1x32xf32, #tpu.memory_space<vmem>>, %arg9: memref<1x64x32xf32, #tpu.memory_space<vmem>>) attributes {dimension_semantics = [#tpu.dimension_semantics<parallel>], iteration_bounds = array<i64: 2>, scalar_prefetch = 0 : i64, scratch_operands = 0 : i64, tpu.core_type = #tpu.core_type<tc>, window_params = [{transform_indices = @transform_0, window_bounds = array<i64: 1, 72, 16>}, {transform_indices = @transform_1, window_bounds = array<i64: 1, 72, 16>}, {transform_indices = @transform_2, window_bounds = array<i64: 1, 72, 16>}, {transform_indices = @transform_3, window_bounds = array<i64: 1, 72, 16>}, {transform_indices = @transform_4, window_bounds = array<i64: 1, 72, 16>}, {transform_indices = @transform_5, window_bounds = array<i64: 1, 72, 16>}, {pipeline_mode = #tpu.pipeline_mode<synchronous>, transform_indices = @transform_6, window_bounds = array<i64: 9, 16, 32>}, {pipeline_mode = #tpu.pipeline_mode<synchronous>, transform_indices = @transform_7, window_bounds = array<i64: 1, 32>}, {transform_indices = @transform_8, window_bounds = array<i64: 1, 64, 32>}]} {
    %cst = arith.constant 0.000000e+00 : f32
    %0 = vector.broadcast %cst : f32 to vector<64x32xf32>
    %c0 = arith.constant 0 : index
    %c0_0 = arith.constant 0 : index
    %c0_1 = arith.constant 0 : index
    %1 = vector.load %arg1[%c0, %c0_0, %c0_1] : memref<1x72x16xbf16, #tpu.memory_space<vmem>>, vector<1x64x16xbf16>
    %2 = vector.shape_cast %1 : vector<1x64x16xbf16> to vector<64x16xbf16>
    %c0_2 = arith.constant 0 : index
    %c0_3 = arith.constant 0 : index
    %c0_4 = arith.constant 0 : index
    %3 = vector.load %arg7[%c0_2, %c0_3, %c0_4] : memref<9x16x32xbf16, #tpu.memory_space<vmem>>, vector<1x16x32xbf16>
    %4 = vector.shape_cast %3 : vector<1x16x32xbf16> to vector<16x32xbf16>
    %cst_5 = arith.constant dense<0.000000e+00> : vector<64x32xf32>
    %5 = tpu.matmul %2, %4, %cst_5 {dimension_numbers = #tpu.dot_dimension_numbers<[1], [0], [0], [1], [0, 0, 1, 1], [], []>} : vector<64x16xbf16>, vector<16x32xbf16>, vector<64x32xf32> -> vector<64x32xf32>
    %6 = arith.addf %0, %5 : vector<64x32xf32>
    %c0_6 = arith.constant 0 : index
    %c0_7 = arith.constant 0 : index
    %c0_8 = arith.constant 0 : index
    %7 = vector.load %arg2[%c0_6, %c0_7, %c0_8] : memref<1x72x16xbf16, #tpu.memory_space<vmem>>, vector<1x64x16xbf16>
    %8 = vector.shape_cast %7 : vector<1x64x16xbf16> to vector<64x16xbf16>
    %c1 = arith.constant 1 : index
    %c0_9 = arith.constant 0 : index
    %c0_10 = arith.constant 0 : index
    %9 = vector.load %arg7[%c1, %c0_9, %c0_10] : memref<9x16x32xbf16, #tpu.memory_space<vmem>>, vector<1x16x32xbf16>
    %10 = vector.shape_cast %9 : vector<1x16x32xbf16> to vector<16x32xbf16>
    %cst_11 = arith.constant dense<0.000000e+00> : vector<64x32xf32>
    %11 = tpu.matmul %8, %10, %cst_11 {dimension_numbers = #tpu.dot_dimension_numbers<[1], [0], [0], [1], [0, 0, 1, 1], [], []>} : vector<64x16xbf16>, vector<16x32xbf16>, vector<64x32xf32> -> vector<64x32xf32>
    %12 = arith.addf %6, %11 : vector<64x32xf32>
    %c0_12 = arith.constant 0 : index
    %c0_13 = arith.constant 0 : index
    %c0_14 = arith.constant 0 : index
    %13 = vector.load %arg3[%c0_12, %c0_13, %c0_14] : memref<1x72x16xbf16, #tpu.memory_space<vmem>>, vector<1x64x16xbf16>
    %14 = vector.shape_cast %13 : vector<1x64x16xbf16> to vector<64x16xbf16>
    %c2 = arith.constant 2 : index
    %c0_15 = arith.constant 0 : index
    %c0_16 = arith.constant 0 : index
    %15 = vector.load %arg7[%c2, %c0_15, %c0_16] : memref<9x16x32xbf16, #tpu.memory_space<vmem>>, vector<1x16x32xbf16>
    %16 = vector.shape_cast %15 : vector<1x16x32xbf16> to vector<16x32xbf16>
    %cst_17 = arith.constant dense<0.000000e+00> : vector<64x32xf32>
    %17 = tpu.matmul %14, %16, %cst_17 {dimension_numbers = #tpu.dot_dimension_numbers<[1], [0], [0], [1], [0, 0, 1, 1], [], []>} : vector<64x16xbf16>, vector<16x32xbf16>, vector<64x32xf32> -> vector<64x32xf32>
    %18 = arith.addf %12, %17 : vector<64x32xf32>
    %c0_18 = arith.constant 0 : index
    %c0_19 = arith.constant 0 : index
    %c0_20 = arith.constant 0 : index
    %19 = vector.load %arg4[%c0_18, %c0_19, %c0_20] : memref<1x72x16xbf16, #tpu.memory_space<vmem>>, vector<1x64x16xbf16>
    %20 = vector.shape_cast %19 : vector<1x64x16xbf16> to vector<64x16xbf16>
    %c3 = arith.constant 3 : index
    %c0_21 = arith.constant 0 : index
    %c0_22 = arith.constant 0 : index
    %21 = vector.load %arg7[%c3, %c0_21, %c0_22] : memref<9x16x32xbf16, #tpu.memory_space<vmem>>, vector<1x16x32xbf16>
    %22 = vector.shape_cast %21 : vector<1x16x32xbf16> to vector<16x32xbf16>
    %cst_23 = arith.constant dense<0.000000e+00> : vector<64x32xf32>
    %23 = tpu.matmul %20, %22, %cst_23 {dimension_numbers = #tpu.dot_dimension_numbers<[1], [0], [0], [1], [0, 0, 1, 1], [], []>} : vector<64x16xbf16>, vector<16x32xbf16>, vector<64x32xf32> -> vector<64x32xf32>
    %24 = arith.addf %18, %23 : vector<64x32xf32>
    %c0_24 = arith.constant 0 : index
    %c0_25 = arith.constant 0 : index
    %c0_26 = arith.constant 0 : index
    %25 = vector.load %arg5[%c0_24, %c0_25, %c0_26] : memref<1x72x16xbf16, #tpu.memory_space<vmem>>, vector<1x64x16xbf16>
    %26 = vector.shape_cast %25 : vector<1x64x16xbf16> to vector<64x16xbf16>
    %c4 = arith.constant 4 : index
    %c0_27 = arith.constant 0 : index
    %c0_28 = arith.constant 0 : index
    %27 = vector.load %arg7[%c4, %c0_27, %c0_28] : memref<9x16x32xbf16, #tpu.memory_space<vmem>>, vector<1x16x32xbf16>
    %28 = vector.shape_cast %27 : vector<1x16x32xbf16> to vector<16x32xbf16>
    %cst_29 = arith.constant dense<0.000000e+00> : vector<64x32xf32>
    %29 = tpu.matmul %26, %28, %cst_29 {dimension_numbers = #tpu.dot_dimension_numbers<[1], [0], [0], [1], [0, 0, 1, 1], [], []>} : vector<64x16xbf16>, vector<16x32xbf16>, vector<64x32xf32> -> vector<64x32xf32>
    %30 = arith.addf %24, %29 : vector<64x32xf32>
    %c0_30 = arith.constant 0 : index
    %c0_31 = arith.constant 0 : index
    %c0_32 = arith.constant 0 : index
    %31 = vector.load %arg6[%c0_30, %c0_31, %c0_32] : memref<1x72x16xbf16, #tpu.memory_space<vmem>>, vector<1x64x16xbf16>
    %32 = vector.shape_cast %31 : vector<1x64x16xbf16> to vector<64x16xbf16>
    %c5 = arith.constant 5 : index
    %c0_33 = arith.constant 0 : index
    %c0_34 = arith.constant 0 : index
    %33 = vector.load %arg7[%c5, %c0_33, %c0_34] : memref<9x16x32xbf16, #tpu.memory_space<vmem>>, vector<1x16x32xbf16>
    %34 = vector.shape_cast %33 : vector<1x16x32xbf16> to vector<16x32xbf16>
    %cst_35 = arith.constant dense<0.000000e+00> : vector<64x32xf32>
    %35 = tpu.matmul %32, %34, %cst_35 {dimension_numbers = #tpu.dot_dimension_numbers<[1], [0], [0], [1], [0, 0, 1, 1], [], []>} : vector<64x16xbf16>, vector<16x32xbf16>, vector<64x32xf32> -> vector<64x32xf32>
    %36 = arith.addf %30, %35 : vector<64x32xf32>
    %c0_36 = arith.constant 0 : index
    %c8 = arith.constant 8 : index
    %c0_37 = arith.constant 0 : index
    %37 = vector.load %arg1[%c0_36, %c8, %c0_37] : memref<1x72x16xbf16, #tpu.memory_space<vmem>>, vector<1x64x16xbf16>
    %38 = vector.shape_cast %37 : vector<1x64x16xbf16> to vector<64x16xbf16>
    %c6 = arith.constant 6 : index
    %c0_38 = arith.constant 0 : index
    %c0_39 = arith.constant 0 : index
    %39 = vector.load %arg7[%c6, %c0_38, %c0_39] : memref<9x16x32xbf16, #tpu.memory_space<vmem>>, vector<1x16x32xbf16>
    %40 = vector.shape_cast %39 : vector<1x16x32xbf16> to vector<16x32xbf16>
    %cst_40 = arith.constant dense<0.000000e+00> : vector<64x32xf32>
    %41 = tpu.matmul %38, %40, %cst_40 {dimension_numbers = #tpu.dot_dimension_numbers<[1], [0], [0], [1], [0, 0, 1, 1], [], []>} : vector<64x16xbf16>, vector<16x32xbf16>, vector<64x32xf32> -> vector<64x32xf32>
    %42 = arith.addf %36, %41 : vector<64x32xf32>
    %c0_41 = arith.constant 0 : index
    %c8_42 = arith.constant 8 : index
    %c0_43 = arith.constant 0 : index
    %43 = vector.load %arg2[%c0_41, %c8_42, %c0_43] : memref<1x72x16xbf16, #tpu.memory_space<vmem>>, vector<1x64x16xbf16>
    %44 = vector.shape_cast %43 : vector<1x64x16xbf16> to vector<64x16xbf16>
    %c7 = arith.constant 7 : index
    %c0_44 = arith.constant 0 : index
    %c0_45 = arith.constant 0 : index
    %45 = vector.load %arg7[%c7, %c0_44, %c0_45] : memref<9x16x32xbf16, #tpu.memory_space<vmem>>, vector<1x16x32xbf16>
    %46 = vector.shape_cast %45 : vector<1x16x32xbf16> to vector<16x32xbf16>
    %cst_46 = arith.constant dense<0.000000e+00> : vector<64x32xf32>
    %47 = tpu.matmul %44, %46, %cst_46 {dimension_numbers = #tpu.dot_dimension_numbers<[1], [0], [0], [1], [0, 0, 1, 1], [], []>} : vector<64x16xbf16>, vector<16x32xbf16>, vector<64x32xf32> -> vector<64x32xf32>
    %48 = arith.addf %42, %47 : vector<64x32xf32>
    %c0_47 = arith.constant 0 : index
    %c8_48 = arith.constant 8 : index
    %c0_49 = arith.constant 0 : index
    %49 = vector.load %arg3[%c0_47, %c8_48, %c0_49] : memref<1x72x16xbf16, #tpu.memory_space<vmem>>, vector<1x64x16xbf16>
    %50 = vector.shape_cast %49 : vector<1x64x16xbf16> to vector<64x16xbf16>
    %c8_50 = arith.constant 8 : index
    %c0_51 = arith.constant 0 : index
    %c0_52 = arith.constant 0 : index
    %51 = vector.load %arg7[%c8_50, %c0_51, %c0_52] : memref<9x16x32xbf16, #tpu.memory_space<vmem>>, vector<1x16x32xbf16>
    %52 = vector.shape_cast %51 : vector<1x16x32xbf16> to vector<16x32xbf16>
    %cst_53 = arith.constant dense<0.000000e+00> : vector<64x32xf32>
    %53 = tpu.matmul %50, %52, %cst_53 {dimension_numbers = #tpu.dot_dimension_numbers<[1], [0], [0], [1], [0, 0, 1, 1], [], []>} : vector<64x16xbf16>, vector<16x32xbf16>, vector<64x32xf32> -> vector<64x32xf32>
    %54 = arith.addf %48, %53 : vector<64x32xf32>
    %c0_54 = arith.constant 0 : index
    %c0_55 = arith.constant 0 : index
    %55 = vector.load %arg8[%c0_54, %c0_55] : memref<1x32xf32, #tpu.memory_space<vmem>>, vector<1x32xf32>
    %56 = vector.broadcast %55 : vector<1x32xf32> to vector<64x32xf32>
    %57 = arith.addf %54, %56 : vector<64x32xf32>
    %c0_56 = arith.constant 0 : index
    %c0_57 = arith.constant 0 : index
    %c0_58 = arith.constant 0 : index
    %58 = vector.load %arg9[%c0_56, %c0_57, %c0_58] : memref<1x64x32xf32, #tpu.memory_space<vmem>>, vector<1x64x32xf32>
    %59 = vector.shape_cast %58 : vector<1x64x32xf32> to vector<64x32xf32>
    %60 = vector.shape_cast %57 : vector<64x32xf32> to vector<1x64x32xf32>
    tpu.vector_store %arg9[%c0_56, %c0_57, %c0_58], %60 {strides = array<i32>} : memref<1x64x32xf32, #tpu.memory_space<vmem>>, vector<1x64x32xf32>,
    return
  }
  func.func @transform_0(%arg0: i32) -> (i32, i32, i32) {
    %c0_i32 = arith.constant 0 : i32
    %c0_i32_0 = arith.constant 0 : i32
    %c0_i32_1 = arith.constant 0 : i32
    return %arg0, %c0_i32, %c0_i32_0 : i32, i32, i32
  }
  func.func @transform_1(%arg0: i32) -> (i32, i32, i32) {
    %c0_i32 = arith.constant 0 : i32
    %c0_i32_0 = arith.constant 0 : i32
    %c0_i32_1 = arith.constant 0 : i32
    return %arg0, %c0_i32, %c0_i32_0 : i32, i32, i32
  }
  func.func @transform_2(%arg0: i32) -> (i32, i32, i32) {
    %c0_i32 = arith.constant 0 : i32
    %c0_i32_0 = arith.constant 0 : i32
    %c0_i32_1 = arith.constant 0 : i32
    return %arg0, %c0_i32, %c0_i32_0 : i32, i32, i32
  }
  func.func @transform_3(%arg0: i32) -> (i32, i32, i32) {
    %c0_i32 = arith.constant 0 : i32
    %c0_i32_0 = arith.constant 0 : i32
    %c0_i32_1 = arith.constant 0 : i32
    return %arg0, %c0_i32, %c0_i32_0 : i32, i32, i32
  }
  func.func @transform_4(%arg0: i32) -> (i32, i32, i32) {
    %c0_i32 = arith.constant 0 : i32
    %c0_i32_0 = arith.constant 0 : i32
    %c0_i32_1 = arith.constant 0 : i32
    return %arg0, %c0_i32, %c0_i32_0 : i32, i32, i32
  }
  func.func @transform_5(%arg0: i32) -> (i32, i32, i32) {
    %c0_i32 = arith.constant 0 : i32
    %c0_i32_0 = arith.constant 0 : i32
    %c0_i32_1 = arith.constant 0 : i32
    return %arg0, %c0_i32, %c0_i32_0 : i32, i32, i32
  }
  func.func @transform_6(%arg0: i32) -> (i32, i32, i32) {
    %c0_i32 = arith.constant 0 : i32
    %c0_i32_0 = arith.constant 0 : i32
    %c0_i32_1 = arith.constant 0 : i32
    %c0_i32_2 = arith.constant 0 : i32
    return %c0_i32, %c0_i32_0, %c0_i32_1 : i32, i32, i32
  }
  func.func @transform_7(%arg0: i32) -> (i32, i32) {
    %c0_i32 = arith.constant 0 : i32
    %c0_i32_0 = arith.constant 0 : i32
    %c0_i32_1 = arith.constant 0 : i32
    return %c0_i32, %c0_i32_0 : i32, i32
  }
  func.func @transform_8(%arg0: i32) -> (i32, i32, i32) {
    %c0_i32 = arith.constant 0 : i32
    %c0_i32_0 = arith.constant 0 : i32
    %c0_i32_1 = arith.constant 0 : i32
    return %arg0, %c0_i32, %c0_i32_0 : i32, i32, i32
  }
}

</mosaic_0001>

<bundles_post_ra>
// kernel: tpu_custom_call.1
= control target key start
LH: loop header
LB: loop body
LE: loop exit
PB: predicated region body
PF: predicated region fallthrough
CT: control target
= control target key end

     0   :  { %s3251_s0 = inlined_call_operand.hbm [shape: bf16[2,72,16], index: 0, kind: input, shape index: {}]   ;;  %s3252_s1 = inlined_call_operand.hbm [shape: bf16[2,72,16], index: 1, kind: input, shape index: {}]   ;;  %s3253_s2 = inlined_call_operand.hbm [shape: bf16[2,72,16], index: 2, kind: input, shape index: {}]   ;;  %s3254_s3 = inlined_call_operand.hbm [shape: bf16[2,72,16], index: 3, kind: input, shape index: {}]   ;;  %s3255_s4 = inlined_call_operand.hbm [shape: bf16[2,72,16], index: 4, kind: input, shape index: {}]   ;;  %s3256_s5 = inlined_call_operand.hbm [shape: bf16[2,72,16], index: 5, kind: input, shape index: {}]   ;;  %s3257_s6 = inlined_call_operand.hbm [shape: bf16[9,16,32], index: 6, kind: input, shape index: {}]   ;;  %s3258_s7 = inlined_call_operand.hbm [shape: f32[1,32], index: 7, kind: input, shape index: {}]   ;;  %s3259_s8 = inlined_call_operand.hbm [shape: f32[2,64,32], index: 8, kind: output, shape index: {}]  }
   0x1   :  { %3285 = sst [smem:[#allocation30_spill]] %s3251_s0 }
   0x2   :  { %3286 = sst [smem:[#allocation31_spill]] %s3252_s1 }
   0x3   :  { %3287 = sst [smem:[#allocation32_spill]] %s3257_s6 }
   0x4   :  { %3288 = sst [smem:[#allocation33_spill]] %s3259_s8 }
   0x5   :  { %13 = vsyncpa [#allocation3], 0 }
   0x6   :  { %15 = vsyncpa [#allocation3 + $0x1], 0 }
   0x7   :  { %16 = vsyncpa [#allocation6], 0 }
   0x8   :  { %18 = vsyncpa [#allocation6 + $0x1], 0 }
   0x9   :  { %19 = vsyncpa [#allocation9], 0 }
   0xa   :  { %21 = vsyncpa [#allocation9 + $0x1], 0 }
   0xb   :  { %22 = vsyncpa [#allocation12], 0 }
   0xc   :  { %24 = vsyncpa [#allocation12 + $0x1], 0 }
   0xd   :  { %25 = vsyncpa [#allocation15], 0 }
   0xe   :  { %26 = vsyncpa [#allocation4], 0 }
   0xf   :  { %28 = vsyncpa [#allocation4 + $0x1], 0  ;;  %s2707_s27 = smov 0   ;;  %s2709_s28 = smov 0  }
  0x10   :  { %s2711_s29 = smov 0   ;;  %s2713_s30 = smov 0  }
  0x11 LB: > { %3289 = sst [smem:[#allocation24_spill]] %s2635_s27  ;;  %s2728_s9 = sadd.s32 4294967295, %s2647_s30   ;;  %s2647_s30 = sphi %s2713_s30, %s3333_s30   ;;  %s2643_s29 = sphi %s2711_s29, %s3337_s29   ;;  %s2639_s28 = sphi %s2709_s28, %s3336_s28   ;;  %s2635_s27 = sphi %s2707_s27, %s3335_s27  }
  0x12   : > { %3290 = sst [smem:[#allocation25_spill]] %s2647_s30  ;;  %s1867_s10 = sadd.s32 4294967294, %s2647_s30  }
  0x13   : > { %s2732_s11 = sadd.s32 1, %s2647_s30   ;;  %s41_s12 = sadd.s32 1, %s2643_s29 }
  0x14   : > { %3291 = sst [smem:[#allocation26_spill]] %s2732_s11  ;;  %s38_s13 = ssub.s32 %s2647_s30, %s2732_s11 }
  0x15   : > { %p48_p0 = scmp.ne.s32.totalorder %s2643_s29, %s2639_s28  ;;  %p39_p1 = scmp.eq.s32.totalorder %s38_s13, 0 }
  0x16   : > { %p49_p2 = scmp.eq.s32.totalorder %s2647_s30, 0  ;;  %p54_p3 = scmp.ne.s32.totalorder %s2639_s28, %s2635_s27 }
  0x17   : > { %p3261_p4 = scmp.eq.s32.totalorder %s2728_s9, 0  ;;  %p250_p7 = scmp.eq.s32.totalorder %s2728_s9, 1 }
  0x18   : > { %s2744_s14 = scalar_select %p39_p1, %s2643_s29, %s41_s12  }
  0x19   : > { %p2746_p5 = por %p49_p2, %p48_p0  ;;  %p2752_p6 = por %p3261_p4, %p54_p3 }
  0x1a   : > { %3292 = sst [smem:[#allocation27_spill]] %s2744_s14  ;;  %p256_p8 = scmp.eq.s32.totalorder %s1867_s10, 1 }
  0x1b   : > { %s3293_s15 = scalar_select %p2746_p5, 1, 0 }
  0x1c   : > { %s3294_s16 = scalar_select %p2752_p6, 1, 0 }
  0x1d   : > { %p1868_p9 = scmp.ge.s32.totalorder %s2647_s30, 1  ;;  %p263_p10 = scmp.lt.s32.totalorder %s2647_s30, 3 }
  0x1e   : > { %p2759_p11 = por %p250_p7, %p48_p0  ;;  %p2763_p12 = por %p256_p8, %p54_p3 }
  0x1f   : > { %p2767_p13 = pnand %p1868_p9, %p263_p10  ;;  %s2649_s20 = smov [#allocation13]  }
  0x20   : > { %s3295_s17 = scalar_select %p2759_p11, 1, 0 }
  0x21   : > { %s3297_s18 = scalar_select %p2763_p12, 1, 0 }
  0x22   : > { %3296 = sst [smem:[#allocation28_spill]] %s3295_s17  ;;  %p2206_p1 = pneg %p2767_p13 }
  0x23   : > { %3298 = sst [smem:[#allocation29_spill]] %s3297_s18  ;;  %s275_s21 = sshll.u32 %s2649_s20, 4  ;;  %s276_s21 = int_to_ptr.vmem [resolvable:$true] %s275_s21 }
  0x24   : > { %s3299_s19 = scalar_select %p2767_p13, 1, 0 }
  0x25   : > { %p2775_p2 = pnand %p2206_p1, %p3261_p4  ;;  %s3260_s23 = sand.u32 1, %s2643_s29  }
  0x26   : > { %s2784_s24 = smul.u32 36, %s3260_s23  ;;  %s3301_s6 = sld [smem:[#allocation32_spill]] }
  0x27   : > { %s3300_s22 = scalar_select %p2775_p2, 1, 0 }
  0x28   : > { %p3272_p8 = pneg %p2775_p2 }
  0x2c   : > { %s2325_s10 = scalar_lea.hbm %s3301_s6, 1152 }
  0x2d   : > { %p2326_p7 = scmp.ne.s32.totalorder %s3301_s6, %s2325_s10  ;;  %p2332_p1 = scmp.lt.u32.totalorder %s2325_s10, %s3301_s6 }
  0x2f   : > { %p2328_p9 = pnand %p3272_p8, %p2326_p7 }
  0x31   : > { %p2329_p10 = pneg %p2328_p9 }
  0x33   : > { %p2334_p0 = pnand %p2332_p1, %p2329_p10 }
  0x35   : > { %2337 = shalt.err (!%p2334_p0)
}
  0x36   : > { %s2338_s23 = scalar_lea.vmem %s276_s21, 1152  ;;  %p2346_p11 = scmp.lt.s32.totalorder %s276_s21, %s276_s21 }
  0x37   : > { %p2339_p4 = scmp.ne.s32.totalorder %s276_s21, %s2338_s23  ;;  %p2347_p6 = scmp.lt.s32.totalorder %s2338_s23, %s2338_s23 }
  0x39   : > { %p2341_p3 = pnand %p2339_p4, %p3272_p8  ;;  %p2348_p13 = por %p2347_p6, %p2346_p11 }
  0x3b   : > { %p2342_p12 = pneg %p2341_p3 }
  0x3d   : > { %p2349_p5 = pnand %p2348_p13, %p2342_p12 }
  0x3f   : > { %2352 = shalt.err (!%p2349_p5)
}
  0x40   : > { %s3268_s25 = smov 64   ;;  %s3270_s14 = smov 4  }
  0x41   : > { %2209 = dma.hbm_to_vmem [thread:$0]  (!%p2775_p2), %s3301_s6, 1152, %s276_s21, [#allocation12], %s3268_s25, %s3268_s25, %s3270_s14  }
  0x42   : > { %p3302_p4 = scmp.ne.s32.totalorder %s3293_s15, 0  ;;  %p3303_p6 = scmp.lt.s32.totalorder %s2647_s30, 2 }
  0x43   : > { %s2820_s12 = smul.u32 576, %s2647_s30  ;;  %s2823_s13 = sand.u32 1, %s2647_s30  }
  0x44   : > { %p2815_p11 = pnand %p3303_p6, %p3302_p4  ;;  %s3305_s1 = sld [smem:[#allocation31_spill]] }
  0x45   : > { %s325_s15 = scalar_lea.vmem [#allocation5], %s2784_s24 }
  0x46   : > { %s3304_s23 = scalar_select %p2815_p11, 1, 0 }
  0x47   : > { %s332_s21 = sshll.u32 %s325_s15, 4  ;;  %p2839_p12 = pneg %p2815_p11  ;;  %s2832_s21 = int_to_ptr.vmem [resolvable:$true] %s332_s21 }
  0x49   : > { %s3306_s25 = scalar_select %p2839_p12, 1, 0 }
  0x4a   : > { %s2829_s18 = scalar_lea.hbm %s3305_s1, %s2820_s12  ;;  %s2358_s14 = scalar_lea.hbm %s3305_s1, 1152 }
  0x4b   : > { %s2353_s10 = scalar_lea.hbm %s2829_s18, 576  ;;  %p2359_p3 = scmp.lt.u32.totalorder %s2829_s18, %s3305_s1 }
  0x4c   : > { %p2354_p5 = scmp.ne.s32.totalorder %s2829_s18, %s2353_s10  ;;  %p2360_p7 = scmp.lt.u32.totalorder %s2358_s14, %s2353_s10 }
  0x4d   : > { %p2362_p10 = scmp.lt.u32.totalorder %s2353_s10, %s2829_s18 }
  0x4e   : > { %p2356_p13 = pnand %p2839_p12, %p2354_p5  ;;  %p2361_p9 = por %p2360_p7, %p2359_p3 }
  0x50   : > { %p2357_p0 = pneg %p2356_p13  ;;  %p2363_p1 = por %p2362_p10, %p2361_p9 }
  0x52   : > { %p2364_p4 = pnand %p2363_p1, %p2357_p0 }
  0x54   : > { %2367 = shalt.err (!%p2364_p4)
}
  0x55   : > { %s2368_s26 = scalar_lea.vmem %s2832_s21, 576  ;;  %s2652_s11 = smov [#allocation5]  }
  0x56   : > { %p2369_p6 = scmp.ne.s32.totalorder %s2832_s21, %s2368_s26  ;;  %s2373_s20 = sshll.u32 %s2652_s11, 4  ;;  %s2374_s20 = int_to_ptr.vmem [resolvable:$false] %s2373_s20 }
  0x57   : > { %s2375_s6 = scalar_lea.vmem %s2374_s20, 1152  ;;  %p2376_p8 = scmp.lt.s32.totalorder %s2832_s21, %s2374_s20 }
  0x58   : > { %p2371_p5 = pnand %p2369_p6, %p2839_p12  ;;  %p2377_p2 = scmp.lt.s32.totalorder %s2375_s6, %s2368_s26 }
  0x5a   : > { %p2372_p13 = pneg %p2371_p5  ;;  %p2378_p3 = por %p2377_p2, %p2376_p8 }
  0x5c   : > { %p2379_p7 = pnand %p2378_p3, %p2372_p13 }
  0x5e   : > { %2382 = shalt.err (!%p2379_p7)
}
  0x5f   : > { %s3307_s14 = smov 4   ;;  %s3308_s10 = smov 64  }
  0x60   : > { %s3309_s15 = scalar_lea.sflag [#allocation6], %s2823_s13  ;;  %s2871_s26 = scalar_lea.hbm %s3254_s3, %s2820_s12 }
  0x61   : > { %2219 = dma.hbm_to_vmem [thread:$0]  (!%p2815_p11), %s2829_s18, 576, %s2832_s21, %s3309_s15, %s3308_s10, %s3308_s10, %s3307_s14  }
  0x62   : > { %s367_s6 = scalar_lea.vmem [#allocation8], %s2784_s24  ;;  %s2653_s30 = smov [#allocation14]  }
  0x63   : > { %s374_s1 = sshll.u32 %s367_s6, 4  ;;  %s2876_s27 = sshll.u32 %s2653_s30, 4  ;;  %s2874_s1 = int_to_ptr.vmem [resolvable:$true] %s374_s1  ;;  %s290_s27 = int_to_ptr.vmem [resolvable:$true] %s2876_s27 }
  0x64   : > { %s3284_s8 = scalar_lea.sflag [#allocation9], %s2823_s13  ;;  %s2383_s17 = scalar_lea.hbm %s2871_s26, 576 }
  0x65   : > { %p2384_p2 = scmp.ne.s32.totalorder %s2871_s26, %s2383_s17  ;;  %s2388_s15 = scalar_lea.hbm %s3254_s3, 1152 }
  0x66   : > { %p2389_p9 = scmp.lt.u32.totalorder %s2871_s26, %s3254_s3  ;;  %p2390_p10 = scmp.lt.u32.totalorder %s2388_s15, %s2383_s17 }
  0x67   : > { %p2386_p8 = pnand %p2384_p2, %p2839_p12  ;;  %p2392_p4 = scmp.lt.u32.totalorder %s2383_s17, %s2871_s26 }
  0x68   : > { %p2391_p1 = por %p2390_p10, %p2389_p9 }
  0x69   : > { %p2387_p0 = pneg %p2386_p8 }
  0x6a   : > { %p2393_p6 = por %p2392_p4, %p2391_p1 }
  0x6c   : > { %p2394_p5 = pnand %p2393_p6, %p2387_p0 }
  0x6e   : > { %2397 = shalt.err (!%p2394_p5)
}
  0x6f   : > { %s2398_s30 = scalar_lea.vmem %s2874_s1, 576  ;;  %s2654_s6 = smov [#allocation8]  }
  0x70   : > { %p2399_p13 = scmp.ne.s32.totalorder %s2874_s1, %s2398_s30  ;;  %s2403_s18 = sshll.u32 %s2654_s6, 4  ;;  %s2404_s18 = int_to_ptr.vmem [resolvable:$false] %s2403_s18 }
  0x71   : > { %s2405_s21 = scalar_lea.vmem %s2404_s18, 1152  ;;  %p2406_p2 = scmp.lt.s32.totalorder %s2874_s1, %s2404_s18 }
  0x72   : > { %p2401_p3 = pnand %p2399_p13, %p2839_p12  ;;  %p2407_p8 = scmp.lt.s32.totalorder %s2405_s21, %s2398_s30 }
  0x74   : > { %p2402_p7 = pneg %p2401_p3  ;;  %p2408_p9 = por %p2407_p8, %p2406_p2 }
  0x76   : > { %p2409_p10 = pnand %p2408_p9, %p2402_p7 }
  0x78   : > { %2412 = shalt.err (!%p2409_p10)
}
  0x79   : > { %2225 = dma.hbm_to_vmem [thread:$0]  (!%p2815_p11), %s2871_s26, 576, %s2874_s1, %s3284_s8, %s3308_s10, %s3308_s10, %s3307_s14  }
  0x7a   : > { %s2413_s11 = scalar_lea.hbm %s3258_s7, 16  ;;  %p3310_p1 = scmp.ne.s32.totalorder %s3300_s22, 0 }
  0x7b   : > { %p2414_p0 = scmp.ne.s32.totalorder %s3258_s7, %s2413_s11  ;;  %p2420_p13 = scmp.lt.u32.totalorder %s2413_s11, %s3258_s7 }
  0x7c   : > { %p3311_p4 = pneg %p3310_p1 }
  0x7e   : > { %p2416_p6 = pnand %p2414_p0, %p3311_p4 }
  0x80   : > { %p2417_p5 = pneg %p2416_p6 }
  0x82   : > { %p2422_p3 = pnand %p2420_p13, %p2417_p5 }
  0x84   : > { %2425 = shalt.err (!%p2422_p3)
}
  0x85   : > { %s2426_s1 = scalar_lea.vmem %s290_s27, 16  ;;  %p3312_p2 = pmov %p3311_p4 }
  0x86   : > { %p2427_p7 = scmp.ne.s32.totalorder %s290_s27, %s2426_s1  ;;  %s2433_s26 = scalar_lea.vmem %s290_s27, 32 }
  0x87   : > { %p2434_p10 = scmp.lt.s32.totalorder %s290_s27, %s290_s27  ;;  %p2435_p11 = scmp.lt.s32.totalorder %s2433_s26, %s2426_s1 }
  0x88   : > { %p2429_p8 = pnand %p2427_p7, %p3312_p2 }
  0x89   : > { %p2436_p12 = por %p2435_p11, %p2434_p10 }
  0x8a   : > { %p2430_p9 = pneg %p2429_p8 }
  0x8c   : > { %p2437_p0 = pnand %p2436_p12, %p2430_p9 }
  0x8e   : > { %2440 = shalt.err (!%p2437_p0)
}
  0x8f   : > { %2212 = dma.hbm_to_vmem [thread:$0]  (!%p3310_p1), %s3258_s7, 16, %s290_s27, [#allocation15]  }
  0x90   : > { %s3313_s0 = sld [smem:[#allocation30_spill]]  ;;  %s304_s30 = scalar_lea.vmem [#allocation2], %s2784_s24 }
  0x91   : > { %s311_s22 = sshll.u32 %s304_s30, 4  ;;  %s2939_s1 = scalar_lea.hbm %s3253_s2, %s2820_s12  ;;  %s2933_s22 = int_to_ptr.vmem [resolvable:$true] %s311_s22 }
  0x92   : > { %s3314_s26 = sand.u32 1, %s2643_s29   ;;  %p3315_p12 = scmp.ne.s32.totalorder %s3306_s25, 0 }
  0x93   : > { %s2943_s27 = scalar_lea.sflag [#allocation3], %s3314_s26 }
  0x96   : > { %s2930_s20 = scalar_lea.hbm %s3313_s0, %s2820_s12  ;;  %s2446_s11 = scalar_lea.hbm %s3313_s0, 1152 }
  0x97   : > { %s2441_s21 = scalar_lea.hbm %s2930_s20, 576  ;;  %p2447_p6 = scmp.lt.u32.totalorder %s2930_s20, %s3313_s0 }
  0x98   : > { %p2442_p11 = scmp.ne.s32.totalorder %s2930_s20, %s2441_s21  ;;  %p2448_p5 = scmp.lt.u32.totalorder %s2446_s11, %s2441_s21 }
  0x99   : > { %p2450_p3 = scmp.lt.u32.totalorder %s2441_s21, %s2930_s20 }
  0x9a   : > { %p2444_p1 = pnand %p2442_p11, %p3315_p12  ;;  %p2449_p13 = por %p2448_p5, %p2447_p6 }
  0x9c   : > { %p2445_p4 = pneg %p2444_p1  ;;  %p2451_p7 = por %p2450_p3, %p2449_p13 }
  0x9e   : > { %p2452_p2 = pnand %p2451_p7, %p2445_p4 }
  0xa0   : > { %2455 = shalt.err (!%p2452_p2)
}
  0xa1   : > { %s2456_s6 = scalar_lea.vmem %s2933_s22, 576  ;;  %s2655_s18 = smov [#allocation2]  }
  0xa2   : > { %p2457_p8 = scmp.ne.s32.totalorder %s2933_s22, %s2456_s6  ;;  %s2461_s26 = sshll.u32 %s2655_s18, 4  ;;  %s2462_s26 = int_to_ptr.vmem [resolvable:$false] %s2461_s26 }
  0xa3   : > { %s2463_s8 = scalar_lea.vmem %s2462_s26, 1152  ;;  %p2464_p0 = scmp.lt.s32.totalorder %s2933_s22, %s2462_s26 }
  0xa4   : > { %p2459_p9 = pnand %p2457_p8, %p3315_p12  ;;  %p2465_p11 = scmp.lt.s32.totalorder %s2463_s8, %s2456_s6 }
  0xa6   : > { %p2460_p10 = pneg %p2459_p9  ;;  %p2466_p1 = por %p2465_p11, %p2464_p0 }
  0xa8   : > { %p2467_p6 = pnand %p2466_p1, %p2460_p10 }
  0xaa   : > { %2470 = shalt.err (!%p2467_p6)
}
  0xab   : > { %p3316_p4 = scmp.ne.s32.totalorder %s3304_s23, 0  ;;  %s346_s21 = scalar_lea.vmem [#allocation7], %s2784_s24 }
  0xac   : > { %s353_s17 = sshll.u32 %s346_s21, 4  ;;  %s2977_s30 = scalar_lea.hbm %s3255_s4, %s2820_s12  ;;  %s2971_s17 = int_to_ptr.vmem [resolvable:$true] %s353_s17 }
  0xad   : > { %2216 = dma.hbm_to_vmem [thread:$0]  (!%p3316_p4), %s2930_s20, 576, %s2933_s22, %s2943_s27, %s3308_s10, %s3308_s10, %s3307_s14  }
  0xae   : > { %s2471_s6 = scalar_lea.hbm %s2939_s1, 576  ;;  %s2476_s8 = scalar_lea.hbm %s3253_s2, 1152 }
  0xaf   : > { %p2472_p5 = scmp.ne.s32.totalorder %s2939_s1, %s2471_s6  ;;  %p2477_p7 = scmp.lt.u32.totalorder %s2939_s1, %s3253_s2 }
  0xb0   : > { %p2478_p2 = scmp.lt.u32.totalorder %s2476_s8, %s2471_s6  ;;  %p2480_p9 = scmp.lt.u32.totalorder %s2471_s6, %s2939_s1 }
  0xb1   : > { %p2474_p13 = pnand %p2472_p5, %p3315_p12 }
  0xb2   : > { %p2479_p8 = por %p2478_p2, %p2477_p7 }
  0xb3   : > { %p2475_p3 = pneg %p2474_p13 }
  0xb4   : > { %p2481_p10 = por %p2480_p9, %p2479_p8 }
  0xb6   : > { %p2482_p0 = pnand %p2481_p10, %p2475_p3 }
  0xb8   : > { %2485 = shalt.err (!%p2482_p0)
}
  0xb9   : > { %s2486_s22 = scalar_lea.vmem %s2971_s17, 576  ;;  %s2656_s27 = smov [#allocation7]  }
  0xba   : > { %p2487_p11 = scmp.ne.s32.totalorder %s2971_s17, %s2486_s22  ;;  %s2491_s21 = sshll.u32 %s2656_s27, 4  ;;  %s2492_s21 = int_to_ptr.vmem [resolvable:$false] %s2491_s21 }
  0xbb   : > { %s2493_s0 = scalar_lea.vmem %s2492_s21, 1152  ;;  %p2494_p5 = scmp.lt.s32.totalorder %s2971_s17, %s2492_s21 }
  0xbc   : > { %p2489_p1 = pnand %p2487_p11, %p3315_p12  ;;  %p2495_p13 = scmp.lt.s32.totalorder %s2493_s0, %s2486_s22 }
  0xbe   : > { %p2490_p6 = pneg %p2489_p1  ;;  %p2496_p7 = por %p2495_p13, %p2494_p5 }
  0xc0   : > { %p2497_p2 = pnand %p2496_p7, %p2490_p6 }
  0xc2   : > { %2500 = shalt.err (!%p2497_p2)
}
  0xc3   : > { %s3317_s15 = scalar_lea.sflag [#allocation6], %s2823_s13  ;;  %s388_s11 = scalar_lea.vmem [#allocation10], %s2784_s24 }
  0xc4   : > { %2222 = dma.hbm_to_vmem [thread:$0]  (!%p3316_p4), %s2939_s1, 576, %s2971_s17, %s3317_s15, %s3308_s10, %s3308_s10, %s3307_s14  }
  0xc5   : > { %s395_s6 = sshll.u32 %s388_s11, 4  ;;  %s2501_s18 = scalar_lea.hbm %s2977_s30, 576  ;;  %s3006_s6 = int_to_ptr.vmem [resolvable:$true] %s395_s6 }
  0xc6   : > { %p2502_p3 = scmp.ne.s32.totalorder %s2977_s30, %s2501_s18  ;;  %s2506_s20 = scalar_lea.hbm %s3255_s4, 1152 }
  0xc7   : > { %p2507_p10 = scmp.lt.u32.totalorder %s2977_s30, %s3255_s4  ;;  %p2508_p0 = scmp.lt.u32.totalorder %s2506_s20, %s2501_s18 }
  0xc8   : > { %p2504_p8 = pnand %p2502_p3, %p3315_p12  ;;  %p2510_p1 = scmp.lt.u32.totalorder %s2501_s18, %s2977_s30 }
  0xc9   : > { %p2509_p11 = por %p2508_p0, %p2507_p10 }
  0xca   : > { %p2505_p9 = pneg %p2504_p8 }
  0xcb   : > { %p2511_p6 = por %p2510_p1, %p2509_p11 }
  0xcd   : > { %p2512_p5 = pnand %p2511_p6, %p2505_p9 }
  0xcf   : > { %2515 = shalt.err (!%p2512_p5)
}
  0xd0   : > { %s2516_s1 = scalar_lea.vmem %s3006_s6, 576  ;;  %s2657_s17 = smov [#allocation10]  }
  0xd1   : > { %p2517_p13 = scmp.ne.s32.totalorder %s3006_s6, %s2516_s1  ;;  %s2521_s21 = sshll.u32 %s2657_s17, 4  ;;  %s2522_s21 = int_to_ptr.vmem [resolvable:$false] %s2521_s21 }
  0xd2   : > { %s2523_s0 = scalar_lea.vmem %s2522_s21, 1152  ;;  %p2524_p3 = scmp.lt.s32.totalorder %s3006_s6, %s2522_s21 }
  0xd3   : > { %p2519_p7 = pnand %p2517_p13, %p3315_p12  ;;  %p2525_p8 = scmp.lt.s32.totalorder %s2523_s0, %s2516_s1 }
  0xd5   : > { %p2520_p2 = pneg %p2519_p7  ;;  %p2526_p10 = por %p2525_p8, %p2524_p3 }
  0xd7   : > { %p2527_p0 = pnand %p2526_p10, %p2520_p2 }
  0xd9   : > { %2530 = shalt.err (!%p2527_p0)
}
  0xda   : > { %s3318_s15 = scalar_lea.sflag [#allocation9], %s2823_s13  ;;  %s3038_s26 = scalar_lea.hbm %s3256_s5, %s2820_s12 }
  0xdb   : > { %2228 = dma.hbm_to_vmem [thread:$0]  (!%p3316_p4), %s2977_s30, 576, %s3006_s6, %s3318_s15, %s3308_s10, %s3308_s10, %s3307_s14  }
  0xdc   : > { %s409_s8 = scalar_lea.vmem [#allocation11], %s2784_s24  ;;  %s406_s22 = scalar_lea.sflag [#allocation12], %s2823_s13 }
  0xdd   : > { %s416_s20 = sshll.u32 %s409_s8, 4  ;;  %s2531_s27 = scalar_lea.hbm %s3038_s26, 576  ;;  %s3041_s20 = int_to_ptr.vmem [resolvable:$true] %s416_s20 }
  0xde   : > { %p2532_p9 = scmp.ne.s32.totalorder %s3038_s26, %s2531_s27  ;;  %s2536_s1 = scalar_lea.hbm %s3256_s5, 1152 }
  0xdf   : > { %p2537_p6 = scmp.lt.u32.totalorder %s3038_s26, %s3256_s5  ;;  %p2538_p5 = scmp.lt.u32.totalorder %s2536_s1, %s2531_s27 }
  0xe0   : > { %p2534_p11 = pnand %p2532_p9, %p3315_p12  ;;  %p2540_p7 = scmp.lt.u32.totalorder %s2531_s27, %s3038_s26 }
  0xe1   : > { %p2539_p13 = por %p2538_p5, %p2537_p6 }
  0xe2   : > { %p2535_p1 = pneg %p2534_p11 }
  0xe3   : > { %p2541_p2 = por %p2540_p7, %p2539_p13 }
  0xe5   : > { %p2542_p3 = pnand %p2541_p2, %p2535_p1 }
  0xe7   : > { %2545 = shalt.err (!%p2542_p3)
}
  0xe8   : > { %s2546_s24 = scalar_lea.vmem %s3041_s20, 576  ;;  %s2658_s21 = smov [#allocation11]  }
  0xe9   : > { %p2547_p8 = scmp.ne.s32.totalorder %s3041_s20, %s2546_s24  ;;  %s2551_s0 = sshll.u32 %s2658_s21, 4  ;;  %s2552_s0 = int_to_ptr.vmem [resolvable:$false] %s2551_s0 }
  0xea   : > { %s2553_s15 = scalar_lea.vmem %s2552_s0, 1152  ;;  %p2554_p9 = scmp.lt.s32.totalorder %s3041_s20, %s2552_s0 }
  0xeb   : > { %p2549_p10 = pnand %p2547_p8, %p3315_p12  ;;  %p2555_p11 = scmp.lt.s32.totalorder %s2553_s15, %s2546_s24 }
  0xed   : > { %p2550_p0 = pneg %p2549_p10  ;;  %p2556_p6 = por %p2555_p11, %p2554_p9 }
  0xef   : > { %p2557_p5 = pnand %p2556_p6, %p2550_p0 }
  0xf1   : > { %2560 = shalt.err (!%p2557_p5)
}
  0xf2   : > { %2231 = dma.hbm_to_vmem [thread:$0]  (!%p3316_p4), %s3038_s26, 576, %s3041_s20, %s406_s22, %s3308_s10, %s3308_s10, %s3307_s14  }
  0xf3   : > { %p3319_p12 = scmp.ne.s32.totalorder %s3299_s19, 0 }
  0xf4   : > { %s3073_s25 = sand.u32 (!%p3319_p12), 1, %s2639_s28   ;;  %p3320_p1 = scmp.ne.s32.totalorder (!%p3319_p12), %s3294_s16, 0 }
  0xf5   : > { %428 = sbr.rel (%p3319_p12) target bundleno = 575 (0x23f), region = 52  ;;  %s431_s18 = scalar_lea.sflag (!%p3319_p12), [#allocation3], %s3073_s25 }
  0xf6   : > { %s2183_s11 = smul.u32 (!%p3319_p12), 36, %s3073_s25 }
  0xf8   : > { %s3077_s23 = scalar_lea.vmem (!%p3319_p12), [#allocation2], %s2183_s11 }
  0xfc   : > { %2606 = dma.done.wait (%p3320_p1), %s431_s18, 576  }
  0xfd   : > { %2608 = vsyncadd (%p3320_p1), %s431_s18, 4294966720  ;;  %s439_s13 = sand.u32 1, %s2728_s9   ;;  %s3084_s14 = scalar_lea.vmem [#allocation5], %s2183_s11 }
  0xfe   : > { %s440_s19 = scalar_lea.sflag [#allocation6], %s439_s13 }
  0xff   : > { %2610 = dma.done.wait (%p3320_p1), %s440_s19, 1152  }
 0x100   : > { %2612 = vsyncadd (%p3320_p1), %s440_s19, 4294966144  ;;  %s3090_s10 = scalar_lea.vmem [#allocation7], %s2183_s11  ;;  %s458_s26 = scalar_lea.sflag [#allocation9], %s439_s13 }
 0x101   : > { %s3092_s8 = scalar_lea.vmem [#allocation8], %s2183_s11 }
 0x102   : > { %2614 = dma.done.wait (%p3320_p1), %s458_s26, 1152  }
 0x103   : > { %2616 = vsyncadd (%p3320_p1), %s458_s26, 4294966144  ;;  %s3098_s20 = scalar_lea.vmem [#allocation10], %s2183_s11  ;;  %s476_s22 = scalar_lea.sflag [#allocation12], %s439_s13 }
 0x104   : > { %s3100_s27 = scalar_lea.vmem [#allocation11], %s2183_s11 }
 0x105   : > { %2618 = dma.done.wait (%p3320_p1), %s476_s22, 576  }
 0x106   : > { %2620 = vsyncadd (%p3320_p1), %s476_s22, 4294966720  ;;  %p3321_p4 = scmp.eq.s32.totalorder %s2728_s9, 0 }
 0x108   : > { %2622 = dma.done.wait (%p3321_p4), [#allocation12], 1152   ;;  %p3322_p13 = pmov %p3321_p4 }
 0x109   : > { %p3323_p7 = pmov %p3321_p4 }
 0x10a   : > { %2624 = vsyncadd (%p3322_p13), [#allocation12], 4294966144 }
 0x10b   : > { %2626 = dma.done.wait (%p3323_p7), [#allocation15], 16   ;;  %p3324_p2 = pmov %p3321_p4 }
 0x10c   : > { %v2280_v0 = vld [vmem:[#allocation13 + $0x8] sm:$0xff]   ;;  %v3114_v1 = vld [vmem:[#allocation13 + $0x20] sm:$0xff]   ;;  %vm593_vm0 = vcmask 130048   ;;  %v2283_v3 = vld [vmem:[%s3098_s20] sm:$0xff]   ;;  %s1881_s16 = sshll.u32 %s3073_s25, 6  ;;  %vm1643_vm1 = vcmask 261120  }
 0x10d   : > { %2628 = vsyncadd (%p3324_p2), [#allocation15], 4294967280  ;;  %2015 = vmatprep.subr.bf16.mxu1 %v2280_v0  ;;  %v2282_v2 = vld [vmem:[%s3084_s14] sm:$0xff]   ;;  %2055 = vmatprep.subr.bf16.mxu0 %v3114_v1  ;;  %v2284_v4 = vld [vmem:[%s3084_s14 + $0x8] sm:$0xff]   ;;  %s544_s30 = scalar_lea.vmem [#allocation16], %s1881_s16  ;;  %s1969_s6 = sshll.u32 %s2728_s9, 10 }
 0x10e   : > { %2016 = vmatpush3.bf16.msra.mxu1 %v2280_v0  ;;  %2056 = vmatpush3.bf16.msra.mxu0 %v3114_v1  ;;  %v2285_v5 = vld [vmem:[#allocation13] sm:$0xff]   ;;  %v2287_v7 = vld [vmem:[#allocation13 + $0x28] sm:$0xff]   ;;  %v2289_v9 = vld [vmem:[%s3084_s14 + $0x18] sm:$0xff]   ;;  %s1666_s1 = sshll.u32 %s544_s30, 4  ;;  %s3325_s12 = sld [smem:[#allocation28_spill]]  ;;  %s3204_s1 = int_to_ptr.vmem [resolvable:$true] %s1666_s1 }
 0x10f   : > { %2017 = vmatprep.mubr.msk.bf16.mxu1 %vm593_vm0, %v2282_v2  ;;  %2057 = vmatprep.mubr.msk.bf16.mxu0 %vm593_vm0, %v2283_v3  ;;  %v2286_v6 = vld [vmem:[%s3098_s20 + $0x8] sm:$0xff]   ;;  %v2288_v8 = vld [vmem:[%s3084_s14 + $0x10] sm:$0xff]   ;;  %v2293_v12 = vld [vmem:[%s3077_s23] sm:$0xff]   ;;  %s3326_s21 = sld [smem:[#allocation33_spill]]  ;;  %s1653_s9 = scalar_lea.sflag [#allocation4], %s3073_s25 }
 0x110   : > { %2025 = vmatprep.subr.bf16.mxu1 %v2285_v5  ;;  %2065 = vmatprep.subr.bf16.mxu0 %v2287_v7  ;;  %v2290_v10 = vld [vmem:[%s3100_s27] sm:$0xff]   ;;  %v2292_v11 = vld [vmem:[#allocation13 + $0x30] sm:$0xff]   ;;  %v2291_v14 = vld [vmem:[%s3100_s27 + $0x8] sm:$0xff]   ;;  %s2561_s15 = scalar_lea.vmem %s3204_s1, 1024  ;;  %s2659_s11 = smov [#allocation16]  }
 0x111   : > { %2018 = vmatmul.mubr.msk.bf16.vlgmr.msra.gmra.mrb[0].mxu1 %vm593_vm0, %v2284_v4  ;;  %2058 = vmatmul.mubr.msk.bf16.vlgmr.msra.gmra.mrb[0].mxu0 %vm593_vm0, %v2286_v6  ;;  %v2295_v13 = vld [vmem:[#allocation13 + $0x10] sm:$0xff]   ;;  %v2294_v16 = vld [vmem:[%s3077_s23 + $0x8] sm:$0xff]   ;;  %v2298_v17 = vld [vmem:[%s3077_s23 + $0x10] sm:$0xff]   ;;  %p2562_p3 = scmp.ne.s32.totalorder %s3204_s1, %s2561_s15  ;;  %s2565_s18 = sshll.u32 %s2659_s11, 4  ;;  %s2566_s18 = int_to_ptr.vmem [resolvable:$false] %s2565_s18 }
 0x112   : > { %2026 = vmatpush3.bf16.msra.mxu1 %v2285_v5  ;;  %2066 = vmatpush3.bf16.msra.mxu0 %v2287_v7  ;;  %v2296_v15 = vld [vmem:[%s3100_s27 + $0x10] sm:$0xff]   ;;  %v2302_v18 = vld [vmem:[#allocation13 + $0x38] sm:$0xff]   ;;  %v2303_v23 = vld [vmem:[%s3090_s10] sm:$0xff]   ;;  %p2568_p9 = scmp.lt.s32.totalorder %s3204_s1, %s2566_s18 }
 0x113   : > { %2021 = vmatprep.mubr.msk.bf16.mxu1 %vm593_vm0, %v2288_v8  ;;  %2067 = vmatprep.mubr.msk.bf16.mxu0 %vm593_vm0, %v2290_v10  ;;  %v2297_v19 = vld [vmem:[%s3100_s27 + $0x18] sm:$0xff]   ;;  %v2299_v22 = vld [vmem:[%s3077_s23 + $0x18] sm:$0xff]   ;;  %v2301_v24 = vld [vmem:[%s3077_s23 + $0xc] sm:$0xff]  }
 0x114   : > { %2075 = vmatprep.subr.bf16.mxu0 %v2292_v11  ;;  %2035 = vmatprep.subr.bf16.mxu1 %v2295_v13  ;;  %v2300_v20 = vld [vmem:[%s3077_s23 + $0x4] sm:$0xff]   ;;  %v2304_v25 = vld [vmem:[%s3090_s10 + $0x8] sm:$0xff]   ;;  %v2312_v27 = vld [vmem:[#allocation13 + $0x40] sm:$0xff]   ;;  %p3327_p8 = scmp.ne.s32.totalorder %s3325_s12, 0 }
 0x115   : > { %v2305_v21 = vld [vmem:[#allocation13 + $0x18] sm:$0xff]   ;;  %v2306_v26 = vld [vmem:[%s3077_s23 + $0x14] sm:$0xff]   ;;  %v2307_v29 = vld [vmem:[%s3077_s23 + $0x1c] sm:$0xff]   ;;  %s3202_s0 = scalar_lea.hbm %s3326_s21, %s1969_s6  ;;  %s2567_s23 = scalar_lea.vmem %s2566_s18, 2048 }
 0x116   : > { %v2308_v28 = vld [vmem:[%s3090_s10 + $0x10] sm:$0xff]   ;;  %v2310_v30 = vld [vmem:[%s3084_s14 + $0x4] sm:$0xff]   ;;  %v2313_v32 = vld [vmem:[%s3092_s8] sm:$0xff]   ;;  %p2563_p10 = pnand %p2562_p3, %p3327_p8  ;;  %p2569_p11 = scmp.lt.s32.totalorder %s2567_s23, %s2561_s15 }
 0x117   : > { %v2309_v31 = vld [vmem:[%s3090_s10 + $0x18] sm:$0xff]   ;;  %v2311_v33 = vld [vmem:[%s3084_s14 + $0xc] sm:$0xff]   ;;  %v2315_v34 = vld [vmem:[%s3084_s14 + $0x14] sm:$0xff]  }
 0x118   : > { %v2314_v35 = vld [vmem:[%s3092_s8 + $0x8] sm:$0xff]   ;;  %v2317_v36 = vld [vmem:[%s3092_s8 + $0x10] sm:$0xff]   ;;  %v2319_v38 = vld [vmem:[%s3090_s10 + $0x4] sm:$0xff]   ;;  %p2564_p0 = pneg %p2563_p10  ;;  %p2570_p6 = por %p2569_p11, %p2568_p9 }
 0x119   : > { %2022 = vmatmul.mubr.msk.bf16.gmra.mrb[4].mxu1 %vm593_vm0, %v2289_v9  ;;  %v2316_v37 = vld [vmem:[%s3084_s14 + $0x1c] sm:$0xff]   ;;  %v2318_v39 = vld [vmem:[%s3092_s8 + $0x18] sm:$0xff]   ;;  %v2320_v41 = vld [vmem:[%s3090_s10 + $0xc] sm:$0xff]  }
 0x11a   : > { %2027 = vmatprep.mubr.msk.bf16.mxu1 %vm593_vm0, %v2293_v12  ;;  %v2321_v40 = vld [vmem:[%s3098_s20 + $0x10] sm:$0xff]   ;;  %v2322_v42 = vld [vmem:[%s3090_s10 + $0x14] sm:$0xff]   ;;  %v2323_v43 = vld [vmem:[%s3098_s20 + $0x18] sm:$0xff]   ;;  %p2571_p5 = pnand %p2570_p6, %p2564_p0 }
 0x11b   : > { %v2324_v44 = vld [vmem:[%s3090_s10 + $0x1c] sm:$0xff]   ;;  %v1963_v50 = vld [vmem:[#allocation14] ss:$0 sm:$0xff] }
 0x11d   : > { %2068 = vmatmul.mubr.msk.bf16.vlgmr.msra.gmra.mrb[0].mxu0 %vm593_vm0, %v2291_v14 }
 0x11e   : > { %2076 = vmatpush3.bf16.msra.mxu0 %v2292_v11  ;;  %2071 = vmatprep.mubr.msk.bf16.mxu0 %vm593_vm0, %v2296_v15 }
 0x11f   : > { %2085 = vmatprep.subr.bf16.mxu0 %v2302_v18 }
 0x121   : > { %2028 = vmatmul.mubr.msk.bf16.vlgmr.msra.gmra.mrb[0].mxu1 %vm593_vm0, %v2294_v16 }
 0x122   : > { %2036 = vmatpush3.bf16.msra.mxu1 %v2295_v13  ;;  %2031 = vmatprep.mubr.msk.bf16.mxu1 %vm593_vm0, %v2298_v17 }
 0x123   : > { %2045 = vmatprep.subr.bf16.mxu1 %v2305_v21 }
 0x125   : > { %2072 = vmatmul.mubr.msk.bf16.gmra.mrb[4].mxu0 %vm593_vm0, %v2297_v19 }
 0x126   : > { %2077 = vmatprep.mubr.msk.bf16.mxu0 %vm593_vm0, %v2300_v20 }
 0x129   : > { %2032 = vmatmul.mubr.msk.bf16.gmra.mrb[4].mxu1 %vm593_vm0, %v2299_v22 }
 0x12a   : > { %2037 = vmatprep.mubr.msk.bf16.mxu1 %vm593_vm0, %v2303_v23 }
 0x12d   : > { %2078 = vmatmul.mubr.msk.bf16.vlgmr.msra.gmra.mrb[0].mxu0 %vm593_vm0, %v2301_v24 }
 0x12e   : > { %2086 = vmatpush3.bf16.msra.mxu0 %v2302_v18  ;;  %2081 = vmatprep.mubr.msk.bf16.mxu0 %vm593_vm0, %v2306_v26 }
 0x12f   : > { %2095 = vmatprep.subr.bf16.mxu0 %v2312_v27 }
 0x131   : > { %2038 = vmatmul.mubr.msk.bf16.vlgmr.msra.gmra.mrb[0].mxu1 %vm593_vm0, %v2304_v25 }
 0x132   : > { %2046 = vmatpush3.bf16.msra.mxu1 %v2305_v21  ;;  %2041 = vmatprep.mubr.msk.bf16.mxu1 %vm593_vm0, %v2308_v28 }
 0x133   : > { %2105 = vmatprep.subr.bf16.mxu1 %v3114_v1 }
 0x135   : > { %2082 = vmatmul.mubr.msk.bf16.gmra.mrb[4].mxu0 %vm593_vm0, %v2307_v29 }
 0x136   : > { %2087 = vmatprep.mubr.msk.bf16.mxu0 %vm593_vm0, %v2310_v30 }
 0x139   : > { %2042 = vmatmul.mubr.msk.bf16.gmra.mrb[4].mxu1 %vm593_vm0, %v2309_v31 }
 0x13a   : > { %2047 = vmatprep.mubr.msk.bf16.mxu1 %vm593_vm0, %v2313_v32 }
 0x13d   : > { %2088 = vmatmul.mubr.msk.bf16.vlgmr.msra.gmra.mrb[0].mxu0 %vm593_vm0, %v2311_v33 }
 0x13e   : > { %2096 = vmatpush3.bf16.msra.mxu0 %v2312_v27  ;;  %2091 = vmatprep.mubr.msk.bf16.mxu0 %vm593_vm0, %v2315_v34 }
 0x141   : > { %2048 = vmatmul.mubr.msk.bf16.vlgmr.msra.gmra.mrb[0].mxu1 %vm593_vm0, %v2314_v35 }
 0x142   : > { %2106 = vmatpush3.bf16.msra.mxu1 %v3114_v1  ;;  %2051 = vmatprep.mubr.msk.bf16.mxu1 %vm593_vm0, %v2317_v36 }
 0x145   : > { %2092 = vmatmul.mubr.msk.bf16.gmra.mrb[4].mxu0 %vm593_vm0, %v2316_v37 }
 0x146   : > { %2097 = vmatprep.mubr.msk.bf16.mxu0 %vm593_vm0, %v2319_v38 }
 0x149   : > { %2052 = vmatmul.mubr.msk.bf16.gmra.mrb[4].mxu1 %vm593_vm0, %v2318_v39 }
 0x14a   : > { %2061 = vmatprep.mubr.msk.bf16.mxu1 %vm593_vm0, %v2321_v40 }
 0x14d   : > { %2098 = vmatmul.mubr.msk.bf16.vlgmr.msra.gmra.mrb[0].mxu0 %vm593_vm0, %v2320_v41 }
 0x14e   : > { %2101 = vmatprep.mubr.msk.bf16.mxu0 %vm593_vm0, %v2322_v42 }
 0x155   : > { %2062 = vmatmul.mubr.msk.bf16.vlgmr.msra.gmra.mrb[4].mxu1 %vm593_vm0, %v2323_v43  ;;  %2102 = vmatmul.mubr.msk.bf16.gmra.mrb[4].mxu0 %vm593_vm0, %v2324_v44 }
 0x214   : > { %v2049_v45 = vpop.f32.mrb[0].mxu1 }
 0x215   : > { %v979_v46 = vpop.f32.mrb[1].mxu1 }
 0x216   : > { %v2050_v47 = vpop.f32.mrb[2].mxu1 }
 0x217   : > { %v982_v48 = vpop.f32.mrb[3].mxu1 }
 0x220   : > { %v2099_v49 = vpop.f32.mrb[0].mxu0 }
 0x221   : > { %v2107_v51 = vadd.f32 %v2099_v49, %v2049_v45  ;;  %v1589_v52 = vpop.f32.mrb[1].mxu0 }
 0x222   : > { %v2108_v53 = vadd.f32 %v1589_v52, %v979_v46  ;;  %v2100_v54 = vpop.f32.mrb[2].mxu0 }
 0x223   : > { %v1637_v55 = vadd.f32 %v2107_v51, %v1963_v50  ;;  %v2109_v56 = vadd.f32 %v2100_v54, %v2050_v47  ;;  %v1592_v57 = vpop.f32.mrb[3].mxu0 }
 0x224   : > { %v1635_v58 = vadd.f32 %v2108_v53, %v1963_v50  ;;  %v2110_v59 = vadd.f32 %v1592_v57, %v982_v48 }
 0x225   : > { %1646 = vst.msk [vmem:[%s544_s30 + $0x10] sm:$0xff] %vm1643_vm1, %v1637_v55  ;;  %v1638_v60 = vadd.f32 %v2109_v56, %v1963_v50 }
 0x226   : > { %1644 = vst.msk [vmem:[%s544_s30] sm:$0xff] %vm1643_vm1, %v1635_v58  ;;  %v1636_v61 = vadd.f32 %v2110_v59, %v1963_v50 }
 0x227   : > { %1647 = vst.msk [vmem:[%s544_s30 + $0x18] sm:$0xff] %vm1643_vm1, %v1638_v60 }
 0x228   : > { %v2063_v62 = vpop.f32.mrb[4].mxu1  ;;  %1645 = vst.msk [vmem:[%s544_s30 + $0x8] sm:$0xff] %vm1643_vm1, %v1636_v61  ;;  %v2103_v0 = vpop.f32.mrb[4].mxu0 }
 0x229   : > { %v1117_v63 = vpop.f32.mrb[5].mxu1  ;;  %v2111_v2 = vadd.f32 %v2103_v0, %v2063_v62  ;;  %v1605_v3 = vpop.f32.mrb[5].mxu0 }
 0x22a   : > { %v2064_v1 = vpop.f32.mrb[6].mxu1  ;;  %v2112_v5 = vadd.f32 %v1605_v3, %v1117_v63  ;;  %v2104_v6 = vpop.f32.mrb[6].mxu0 }
 0x22b   : > { %v1120_v4 = vpop.f32.mrb[7].mxu1  ;;  %v1641_v7 = vadd.f32 %v2111_v2, %v1963_v50  ;;  %v2113_v8 = vadd.f32 %v2104_v6, %v2064_v1  ;;  %v1608_v9 = vpop.f32.mrb[7].mxu0 }
 0x22c   : > { %v1639_v10 = vadd.f32 %v2112_v5, %v1963_v50  ;;  %v2114_v11 = vadd.f32 %v1608_v9, %v1120_v4 }
 0x22d   : > { %1650 = vst.msk [vmem:[%s544_s30 + $0x30] sm:$0xff] %vm1643_vm1, %v1641_v7  ;;  %v1642_v12 = vadd.f32 %v2113_v8, %v1963_v50 }
 0x22e   : > { %1648 = vst.msk [vmem:[%s544_s30 + $0x20] sm:$0xff] %vm1643_vm1, %v1639_v10  ;;  %v1640_v13 = vadd.f32 %v2114_v11, %v1963_v50 }
 0x22f   : > { %1651 = vst.msk [vmem:[%s544_s30 + $0x38] sm:$0xff] %vm1643_vm1, %v1642_v12 }
 0x230   : > { %1649 = vst.msk [vmem:[%s544_s30 + $0x28] sm:$0xff] %vm1643_vm1, %v1640_v13 }
 0x231   : > { %2574 = shalt.err (!%p2571_p5)
}
 0x232   : > { %s2575_s13 = scalar_lea.hbm %s3202_s0, 1024  ;;  %s2579_s10 = scalar_lea.hbm %s3326_s21, 2048 }
 0x233   : > { %p2576_p12 = scmp.ne.s32.totalorder %s3202_s0, %s2575_s13  ;;  %p2580_p13 = scmp.lt.u32.totalorder %s3202_s0, %s3326_s21 }
 0x234   : > { %p2581_p7 = scmp.lt.u32.totalorder %s2579_s10, %s2575_s13  ;;  %p2583_p3 = scmp.lt.u32.totalorder %s2575_s13, %s3202_s0 }
 0x235   : > { %p2577_p1 = pnand %p2576_p12, %p3327_p8 }
 0x236   : > { %p2582_p2 = por %p2581_p7, %p2580_p13 }
 0x237   : > { %p2578_p4 = pneg %p2577_p1 }
 0x238   : > { %p2584_p10 = por %p2583_p3, %p2582_p2 }
 0x23a   : > { %p2585_p0 = pnand %p2584_p10, %p2578_p4 }
 0x23c   : > { %2588 = shalt.err (!%p2585_p0)
}
 0x23d   : > { %s2660_s20 = smov 128   ;;  %s2661_s22 = smov 8  }
 0x23e   : > { %2204 = dma.vmem_to_hbm [thread:$0]  (%p3327_p8), %s3204_s1, 1024, %s3202_s0, %s1653_s9, %s2660_s20, %s2660_s20, %s2661_s22  }
 0x23f PF: > { %s3328_s27 = sld [smem:[#allocation24_spill]]  ;;  %s3329_s16 = sld [smem:[#allocation29_spill]] }
 0x240   : > { %s3330_s30 = sld [smem:[#allocation25_spill]] }
 0x245   : > { %s1681_s6 = sand.u32 1, %s3328_s27   ;;  %p3331_p9 = scmp.ne.s32.totalorder %s3329_s16, 0 }
 0x246   : > { %p3332_p11 = scmp.ge.s32.totalorder %s3330_s30, 2  ;;  %s1682_s17 = scalar_lea.sflag [#allocation4], %s1681_s6 }
 0x248   : > { %p2233_p6 = pnand %p3332_p11, %p3331_p9 }
 0x24a   : > { %2630 = dma.done.wait (!%p2233_p6), %s1682_s17, 1024  }
 0x24b   : > { %2632 = vsyncadd (!%p2233_p6), %s1682_s17, 4294966272  ;;  %s3333_s30 = sld [smem:[#allocation26_spill]]  ;;  %s3334_s24 = sld [smem:[#allocation27_spill]] }
 0x24c   : > { %s3335_s27 = smov %s2639_s28  ;;  %s3336_s28 = smov %s2643_s29 }
 0x251   : > { %p31_p5 = scmp.ge.s32.totalorder %s3333_s30, 4   ;;  %s3337_s29 = smov %s3334_s24 }
 0x253   :  { %33 = sbr.rel (!%p31_p5) target bundleno = 17 (0x11), region = 174 }
 0x25a   :  { %1687 = vsyncpa [#allocation3], 1 }
 0x25b   :  { %1689 = vsyncpa [#allocation3 + $0x1], 1 }
 0x25c   :  { %1690 = vsyncpa [#allocation6], 1 }
 0x25d   :  { %1692 = vsyncpa [#allocation6 + $0x1], 1 }
 0x25e   :  { %1693 = vsyncpa [#allocation9], 1 }
 0x25f   :  { %1695 = vsyncpa [#allocation9 + $0x1], 1 }
 0x260   :  { %1696 = vsyncpa [#allocation12], 1 }
 0x261   :  { %1698 = vsyncpa [#allocation12 + $0x1], 1 }
 0x262   :  { %1699 = vsyncpa [#allocation15], 1 }
 0x263   :  { %1700 = vsyncpa [#allocation4], 1 }
 0x264   :  { %1702 = vsyncpa [#allocation4 + $0x1], 1 }

</bundles_post_ra>
